<compile_context>
chip_gen: v6e
topology: v6e:2x2x1
jax: 0.10.0
libtpu: 0.0.40
codegen_flags: <defaults>
</compile_context>

<pallas_src>
import jax
import jax.numpy as jnp
from jax.experimental import pallas as pl
from jax.experimental.pallas import tpu as pltpu

LANE = 128
SUBLANE = 8


def _round_up(x, m):
    return (x + m - 1) // m * m


def _outconv_kernel(x_ref, w_ref, b_ref, o_ref):
    # x_ref: (C_in, T)   -- channels on sublanes, spatial on lanes (lane-dense)
    # w_ref: (C_out, C_in) -- constant index_map => DMA'd once, resident in VMEM
    # b_ref: (C_out, 1)
    # o_ref: (C_out, T)
    #
    # Tiny contraction (M=C_out, K=C_in): unrolled VPU broadcast-FMA
    #   acc[o, :] = b[o] + sum_c w[o, c] * x[c, :]
    # instead of a padded MXU matmul. The kernel is HBM-bandwidth bound; this
    # compute is free filler in idle VALU slots.
    x = x_ref[...].astype(jnp.float32)          # (C_in, T)
    w = w_ref[...].astype(jnp.float32)          # (C_out, C_in)
    b = b_ref[...].astype(jnp.float32)          # (C_out, 1)
    c_in = x.shape[0]
    acc = w[:, 0:1] * x[0:1, :] + b             # (C_out, T), f32 accumulate
    for c in range(1, c_in):
        acc = acc + w[:, c:c + 1] * x[c:c + 1, :]
    o_ref[...] = jnp.maximum(acc, 0.0).astype(o_ref.dtype)


def outconv_pallas(x_nchw, weight, bias, *, tile_hw=32768,
                   vmem_budget_bytes=12 * 1024 * 1024):
    """1x1 conv + ReLU (UNet OutConv).

    x_nchw: (N, C_in, H, W) float32
    weight: (C_out, C_in) or (C_out, C_in, 1, 1) float32
    bias:   (C_out,) float32
    returns (N, C_out, H, W) float32
    """
    N, C_in, H, W = x_nchw.shape
    if weight.ndim == 4:
        weight = weight.reshape(weight.shape[0], weight.shape[1])
    C_out = weight.shape[0]
    assert weight.shape == (C_out, C_in)
    assert tile_hw % LANE == 0, "tile_hw must be a multiple of 128 lanes"

    HW = H * W

    # ---- Spatial tile selection ------------------------------------------
    # Cap the tile so double-buffered input/output blocks plus one f32 temp
    # (all sublane-padded to multiples of 8) stay inside the VMEM budget,
    # which keeps us under the scoped-VMEM default on v5e/v6e/v7x even for
    # the real UNet head (C_in = 64).
    bytes_per_lane = (_round_up(C_in, SUBLANE) + 2 * _round_up(C_out, SUBLANE)) * 4
    tile_cap = max(LANE, (vmem_budget_bytes // (2 * bytes_per_lane)) // LANE * LANE)

    if HW <= LANE:
        # Full-extent block (always layout-legal, no masking needed).
        tile = HW
    else:
        hw_floor = (HW // LANE) * LANE          # largest lane-aligned tile <= HW
        tile = min(tile_hw, tile_cap, hw_floor)
        if N == 1:
            # v7x has 2 TensorCores and shards "parallel" grid axes across
            # them: keep >= 2 spatial tiles when the batch axis is 1.
            tile = min(tile, _round_up(pl.cdiv(HW, 2), LANE))

    grid = (N, pl.cdiv(HW, tile))

    # Channel-major flatten; no transposes, no padding, no output slice.
    # The ragged tail (HW % tile != 0) is handled by Pallas partial-block
    # masking on the last axis.
    x_flat = x_nchw.reshape(N, C_in, HW)
    b_col = bias.reshape(C_out, 1)

    cost = pl.CostEstimate(
        flops=2 * N * HW * C_in * C_out,
        bytes_accessed=4 * N * HW * (C_in + C_out) + 4 * C_out * (C_in + 1),
        transcendentals=0,
    )

    out_flat = pl.pallas_call(
        _outconv_kernel,
        out_shape=jax.ShapeDtypeStruct((N, C_out, HW), x_nchw.dtype),
        grid_spec=pltpu.PrefetchScalarGridSpec(
            num_scalar_prefetch=0,
            grid=grid,
            in_specs=[
                # Lane-dense activation tile; batch dim squeezed out of the Ref.
                pl.BlockSpec((pl.Squeezed(), C_in, tile),
                             lambda n, j: (n, 0, j)),
                # Weight / bias: tiny blocks with constant index_map -> DMA'd
                # once and kept resident in VMEM across the whole grid.
                pl.BlockSpec((C_out, C_in), lambda n, j: (0, 0)),
                pl.BlockSpec((C_out, 1), lambda n, j: (0, 0)),
            ],
            out_specs=pl.BlockSpec((pl.Squeezed(), C_out, tile),
                                   lambda n, j: (n, 0, j)),
        ),
        compiler_params=pltpu.CompilerParams(
            # Both grid axes are independent -> shardable across 2 TCs on v7x.
            dimension_semantics=("parallel", "parallel"),
        ),
        cost_estimate=cost,
    )(x_flat, weight, b_col)

    return out_flat.reshape(N, C_out, H, W)


def outconv_reference(x_nchw, weight, bias):
    # pure-JAX reference of Conv2d(kernel_size=1) + ReLU
    if weight.ndim == 4:
        weight = weight.reshape(weight.shape[0], weight.shape[1])
    y = jnp.einsum("nchw,oc->nohw", x_nchw, weight) + bias[None, :, None, None]
    return jnp.maximum(y, 0.0)


if __name__ == "__main__":
    key = jax.random.PRNGKey(0)
    k_x, k_w, k_b, k_x2 = jax.random.split(key, 4)

    N, C_in, H, W = 2, 4, 16, 16
    n_classes = 3

    x = jax.random.normal(k_x, (N, C_in, H, W), dtype=jnp.float32)
    # deterministic synthetic parameters (nn.Conv2d(in, n_classes, k=1) with
    # the trailing 1x1 kernel dims squeezed)
    weight = jax.random.normal(k_w, (n_classes, C_in), dtype=jnp.float32) * 0.1
    bias = jax.random.normal(k_b, (n_classes,), dtype=jnp.float32) * 0.1

    out = jax.block_until_ready(outconv_pallas(x, weight, bias))
    ref = outconv_reference(x, weight, bias)
    assert out.shape == (N, n_classes, H, W)
    assert jnp.allclose(out, ref, atol=1e-5, rtol=1e-5)

    # Ragged spatial extent (H*W = 169, not a multiple of 128) exercises the
    # in-kernel partial-block masking path (no wrapper pad / slice round-trip).
    x2 = jax.random.normal(k_x2, (N, C_in, 13, 13), dtype=jnp.float32)
    out2 = jax.block_until_ready(outconv_pallas(x2, weight, bias))
    ref2 = outconv_reference(x2, weight, bias)
    assert out2.shape == (N, n_classes, 13, 13)
    assert jnp.allclose(out2, ref2, atol=1e-5, rtol=1e-5)

    print("KERNEL_OK")
</pallas_src>

<mosaic_0001>
module attributes {stable_mosaic.version = 11 : i64} {
  func.func @_outconv_kernel(%arg0: i32, %arg1: i32, %arg2: memref<1x4x256xf32, #tpu.memory_space<vmem>>, %arg3: memref<3x4xf32, #tpu.memory_space<vmem>>, %arg4: memref<3x1xf32, #tpu.memory_space<vmem>>, %arg5: memref<1x3x256xf32, #tpu.memory_space<vmem>>) attributes {dimension_semantics = [#tpu.dimension_semantics<parallel>, #tpu.dimension_semantics<parallel>], iteration_bounds = array<i64: 2, 1>, scalar_prefetch = 0 : i64, scratch_operands = 0 : i64, tpu.core_type = #tpu.core_type<tc>, window_params = [{transform_indices = @transform_0, window_bounds = array<i64: 1, 4, 256>}, {pipeline_mode = #tpu.pipeline_mode<synchronous>, transform_indices = @transform_1, window_bounds = array<i64: 3, 4>}, {pipeline_mode = #tpu.pipeline_mode<synchronous>, transform_indices = @transform_2, window_bounds = array<i64: 3, 1>}, {transform_indices = @transform_3, window_bounds = array<i64: 1, 3, 256>}]} {
    %c0 = arith.constant 0 : index
    %c0_0 = arith.constant 0 : index
    %c0_1 = arith.constant 0 : index
    %0 = vector.load %arg2[%c0, %c0_0, %c0_1] : memref<1x4x256xf32, #tpu.memory_space<vmem>>, vector<1x4x256xf32>
    %1 = vector.shape_cast %0 : vector<1x4x256xf32> to vector<4x256xf32>
    %c0_2 = arith.constant 0 : index
    %c0_3 = arith.constant 0 : index
    %2 = vector.load %arg3[%c0_2, %c0_3] : memref<3x4xf32, #tpu.memory_space<vmem>>, vector<3x4xf32>
    %c0_4 = arith.constant 0 : index
    %c0_5 = arith.constant 0 : index
    %3 = vector.load %arg4[%c0_4, %c0_5] : memref<3x1xf32, #tpu.memory_space<vmem>>, vector<3x1xf32>
    %4 = vector.extract_strided_slice %2 {offsets = [0, 0], sizes = [3, 1], strides = [1, 1]} : vector<3x4xf32> to vector<3x1xf32>
    %5 = vector.extract_strided_slice %1 {offsets = [0, 0], sizes = [1, 256], strides = [1, 1]} : vector<4x256xf32> to vector<1x256xf32>
    %6 = vector.broadcast %4 : vector<3x1xf32> to vector<3x256xf32>
    %7 = vector.broadcast %5 : vector<1x256xf32> to vector<3x256xf32>
    %8 = arith.mulf %6, %7 : vector<3x256xf32>
    %9 = vector.broadcast %3 : vector<3x1xf32> to vector<3x256xf32>
    %10 = arith.addf %8, %9 : vector<3x256xf32>
    %11 = vector.extract_strided_slice %2 {offsets = [0, 1], sizes = [3, 1], strides = [1, 1]} : vector<3x4xf32> to vector<3x1xf32>
    %12 = vector.extract_strided_slice %1 {offsets = [1, 0], sizes = [1, 256], strides = [1, 1]} : vector<4x256xf32> to vector<1x256xf32>
    %13 = vector.broadcast %11 : vector<3x1xf32> to vector<3x256xf32>
    %14 = vector.broadcast %12 : vector<1x256xf32> to vector<3x256xf32>
    %15 = arith.mulf %13, %14 : vector<3x256xf32>
    %16 = arith.addf %10, %15 : vector<3x256xf32>
    %17 = vector.extract_strided_slice %2 {offsets = [0, 2], sizes = [3, 1], strides = [1, 1]} : vector<3x4xf32> to vector<3x1xf32>
    %18 = vector.extract_strided_slice %1 {offsets = [2, 0], sizes = [1, 256], strides = [1, 1]} : vector<4x256xf32> to vector<1x256xf32>
    %19 = vector.broadcast %17 : vector<3x1xf32> to vector<3x256xf32>
    %20 = vector.broadcast %18 : vector<1x256xf32> to vector<3x256xf32>
    %21 = arith.mulf %19, %20 : vector<3x256xf32>
    %22 = arith.addf %16, %21 : vector<3x256xf32>
    %23 = vector.extract_strided_slice %2 {offsets = [0, 3], sizes = [3, 1], strides = [1, 1]} : vector<3x4xf32> to vector<3x1xf32>
    %24 = vector.extract_strided_slice %1 {offsets = [3, 0], sizes = [1, 256], strides = [1, 1]} : vector<4x256xf32> to vector<1x256xf32>
    %25 = vector.broadcast %23 : vector<3x1xf32> to vector<3x256xf32>
    %26 = vector.broadcast %24 : vector<1x256xf32> to vector<3x256xf32>
    %27 = arith.mulf %25, %26 : vector<3x256xf32>
    %28 = arith.addf %22, %27 : vector<3x256xf32>
    %cst = arith.constant 0.000000e+00 : f32
    %29 = vector.broadcast %cst : f32 to vector<3x256xf32>
    %30 = arith.maximumf %28, %29 : vector<3x256xf32>
    %c0_6 = arith.constant 0 : index
    %c0_7 = arith.constant 0 : index
    %c0_8 = arith.constant 0 : index
    %31 = vector.load %arg5[%c0_6, %c0_7, %c0_8] : memref<1x3x256xf32, #tpu.memory_space<vmem>>, vector<1x3x256xf32>
    %32 = vector.shape_cast %31 : vector<1x3x256xf32> to vector<3x256xf32>
    %33 = vector.shape_cast %30 : vector<3x256xf32> to vector<1x3x256xf32>
    tpu.vector_store %arg5[%c0_6, %c0_7, %c0_8], %33 {strides = array<i32>} : memref<1x3x256xf32, #tpu.memory_space<vmem>>, vector<1x3x256xf32>,
    return
  }
  func.func @transform_0(%arg0: i32, %arg1: i32) -> (i32, i32, i32) {
    %c0_i32 = arith.constant 0 : i32
    %c0_i32_0 = arith.constant 0 : i32
    return %arg0, %c0_i32, %arg1 : i32, i32, i32
  }
  func.func @transform_1(%arg0: i32, %arg1: i32) -> (i32, i32) {
    %c0_i32 = arith.constant 0 : i32
    %c0_i32_0 = arith.constant 0 : i32
    %c0_i32_1 = arith.constant 0 : i32
    return %c0_i32, %c0_i32_0 : i32, i32
  }
  func.func @transform_2(%arg0: i32, %arg1: i32) -> (i32, i32) {
    %c0_i32 = arith.constant 0 : i32
    %c0_i32_0 = arith.constant 0 : i32
    %c0_i32_1 = arith.constant 0 : i32
    return %c0_i32, %c0_i32_0 : i32, i32
  }
  func.func @transform_3(%arg0: i32, %arg1: i32) -> (i32, i32, i32) {
    %c0_i32 = arith.constant 0 : i32
    %c0_i32_0 = arith.constant 0 : i32
    return %arg0, %c0_i32, %arg1 : i32, i32, i32
  }
}

</mosaic_0001>

<bundles_post_ra>
// kernel: tpu_custom_call.1
= control target key start
LH: loop header
LB: loop body
LE: loop exit
PB: predicated region body
PF: predicated region fallthrough
CT: control target
= control target key end

     0   :  { %8 = vsyncpa [#allocation3], 0  ;;  %s722_s0 = inlined_call_operand.hbm [shape: f32[2,4,256], index: 0, kind: input, shape index: {}]   ;;  %s723_s1 = inlined_call_operand.vmem [shape: f32[3,4], index: 1, kind: input, shape index: {}]   ;;  %s724_s2 = inlined_call_operand.vmem [shape: f32[3,1], index: 2, kind: input, shape index: {}]   ;;  %s725_s3 = inlined_call_operand.vmem [shape: f32[2,3,256], index: 3, kind: output, shape index: {}]  }
   0x1   :  { %10 = vsyncpa [#allocation3 + $0x1], 0  ;;  %s616_s12 = smov 0   ;;  %s618_s13 = smov 0  }
   0x2   :  { %s620_s14 = smov 0   ;;  %s622_s15 = smov 0  }
   0x3   :  { %s624_s16 = smov 0   ;;  %s626_s17 = smov 0  }
   0x4 LB: > { %s433_s18 = sadd.s32 4294967295, %s589_s17   ;;  %s28_s19 = sadd.s32 1, %s585_s16  ;;  %s589_s17 = sphi %s626_s17, %s16_s17   ;;  %s585_s16 = sphi %s624_s16, %s733_s16   ;;  %s581_s15 = sphi %s622_s15, %s732_s15   ;;  %s577_s14 = sphi %s620_s14, %s731_s14   ;;  %s573_s13 = sphi %s618_s13, %s730_s13   ;;  %s569_s12 = sphi %s616_s12, %s729_s12  }
   0x5   : > { %p30_p0 = scmp.ge.s32.totalorder %s28_s19, 2  ;;  %s37_s20 = sadd.s32 1, %s577_s14 }
   0x6   : > { %p44_p1 = scmp.ne.s32.totalorder %s577_s14, %s573_s13  ;;  %p45_p2 = scmp.eq.s32.totalorder %s589_s17, 0 }
   0x7   : > { %s735_s19 = smov (%p30_p0, %s28_s19), 0  ;;  %p50_p4 = scmp.ne.s32.totalorder %s573_s13, %s569_s12 }
   0x8   : > { %p652_p3 = por %p45_p2, %p44_p1  ;;  %s32_s22 = ssub.s32 %s585_s16, %s735_s19 }
   0x9   : > { %p51_p5 = scmp.eq.s32.totalorder %s433_s18, 0  ;;  %p35_p6 = scmp.eq.s32.totalorder %s32_s22, 0 }
   0xa   : > { %p454_p8 = scmp.lt.s32.totalorder %s589_s17, 2  ;;  %s150_s25 = sand.u32 1, %s577_s14  }
   0xb   : > { %p659_p7 = por %p51_p5, %p50_p4  ;;  %s446_s26 = sshll.u32 %s585_s16, 7 }
   0xc   : > { %s665_s24 = scalar_select %p35_p6, %s577_s14, %s37_s20  }
   0xd   : > { %s437_s27 = sshll.u32 %s150_s25, 3  ;;  %s162_s30 = scalar_lea.hbm %s722_s0, %s446_s26 }
   0xe   : > { %s154_s4 = scalar_lea.vmem [#allocation2], %s437_s27  ;;  %p674_p9 = pnand %p454_p8, %p652_p3 }
   0xf   : > { %s164_s5 = sshll.u32 %s154_s4, 4  ;;  %p440_p10 = scmp.ge.s32.totalorder %s589_s17, 1  ;;  %s165_s5 = int_to_ptr.vmem [resolvable:$true] %s164_s5 }
  0x10   : > { %p169_p11 = scmp.lt.s32.totalorder %s589_s17, 3  ;;  %s151_s7 = scalar_lea.sflag [#allocation3], %s150_s25 }
  0x11   : > { %p513_p12 = pneg %p674_p9  ;;  %s524_s8 = scalar_lea.vmem %s165_s5, 128 }
  0x12   : > { %p525_p13 = scmp.ne.s32.totalorder %s165_s5, %s524_s8  ;;  %s591_s9 = smov [#allocation2]  }
  0x13   : > { %s529_s10 = sshll.u32 %s591_s9, 4  ;;  %s530_s10 = int_to_ptr.vmem [resolvable:$false] %s529_s10 }
  0x14   : > { %p527_p0 = pnand %p525_p13, %p513_p12  ;;  %s531_s11 = scalar_lea.vmem %s530_s10, 256 }
  0x15   : > { %p532_p2 = scmp.lt.s32.totalorder %s165_s5, %s530_s10  ;;  %p533_p3 = scmp.lt.s32.totalorder %s531_s11, %s524_s8 }
  0x16   : > { %p528_p1 = pneg %p527_p0 }
  0x17   : > { %p534_p4 = por %p533_p3, %p532_p2 }
  0x19   : > { %p535_p5 = pnand %p534_p4, %p528_p1 }
  0x1b   : > { %538 = shalt.err (!%p535_p5)
}
  0x1c   : > { %453 = dma.hbm_to_vmem [thread:$0]  (!%p674_p9), %s162_s30, 128, %s165_s5, %s151_s7  }
  0x1d   : > { %p170_p6 = pnand %p440_p10, %p169_p11 }
  0x1e   : > { %s175_s12 = sand.u32 (!%p170_p6), 1, %s573_s13  }
  0x1f   : > { %173 = sbr.rel (%p170_p6) target bundleno = 181 (0xb5), region = 32  ;;  %s441_s18 = sshll.u32 (!%p170_p6), %s175_s12, 3 }
  0x20   : > { %s176_s20 = scalar_lea.sflag (!%p170_p6), [#allocation3], %s175_s12  ;;  %s179_s21 = scalar_lea.vmem (!%p170_p6), [#allocation2], %s441_s18 }
  0x24   : > { %564 = dma.done.wait (%p659_p7), %s176_s20, 128  }
  0x25   : > { %566 = vsyncadd (%p659_p7), %s176_s20, 4294967168  ;;  %v592_v0 = vmov 0   ;;  %v593_v1 = vmov 1   ;;  %v218_v2 = vld [vmem:[%s723_s1] sm:$0x7]  ;;  %v594_v4 = vmov 2   ;;  %v226_v6 = vlaneseq }
  0x26   : > { %507 = vset.pattern.permute.xlu0 %v592_v0  ;;  %508 = vset.pattern.permute.xlu1 %v593_v1  ;;  %v219_v3 = vld [vmem:[%s724_s2] sm:$0x7]  ;;  %v595_v5 = vmov 3   ;;  %p208_p7 = scmp.lt.s32.totalorder %s581_s15, 1 }
  0x27   : > { %222 = vperm.xlu0 %507, %v218_v2   ;;  %254 = vperm.xlu1 %508, %v218_v2   ;;  %v227_v7 = vshrl.u32 %v226_v6, 7  ;;  %v217_v10 = vld [vmem:[%s179_s21] sm:$0xff] }
  0x28   : > { %s737_s15 = smov (!%p208_p7, %s581_s15), 1 }
  0x29   : > { %v228_v8 = vsub.s32 0, %v227_v7  ;;  %v232_v9 = vsub.s32 4, %v227_v7  ;;  %v259_v11 = vsub.s32 1, %v227_v7  ;;  %v263_v12 = vsub.s32 5, %v227_v7  ;;  %s447_s23 = sshll.u32 %s737_s15, 3 }
  0x2a   : > { %v285_v13 = vsub.s32 2, %v227_v7  ;;  %v289_v14 = vsub.s32 6, %v227_v7  ;;  %v311_v21 = vsub.s32 3, %v227_v7  ;;  %v315_v22 = vsub.s32 7, %v227_v7  ;;  %s215_s30 = scalar_lea.vmem %s725_s3, %s447_s23 }
  0x2b   : > { %248 = vperm.xlu0 %507, %v219_v3   ;;  %509 = vset.pattern.permute.xlu1 %v594_v4  ;;  %v229_v15 = vrot.slane %v217_v10, %v228_v8  ;;  %v233_v16 = vrot.slane %v217_v10, %v232_v9  ;;  %v260_v17 = vrot.slane %v217_v10, %v259_v11 }
  0x2c   : > { %280 = vperm.xlu1 %509, %v218_v2   ;;  %v264_v18 = vrot.slane %v217_v10, %v263_v12  ;;  %v286_v19 = vrot.slane %v217_v10, %v285_v13  ;;  %v290_v20 = vrot.slane %v217_v10, %v289_v14  ;;  %v312_v31 = vrot.slane %v217_v10, %v311_v21 }
  0x2d   : > { %v239_v23 = vrot.slane %v229_v15, %v228_v8  ;;  %v243_v24 = vrot.slane %v233_v16, %v228_v8  ;;  %v270_v27 = vrot.slane %v260_v17, %v259_v11  ;;  %v316_v32 = vrot.slane %v217_v10, %v315_v22 }
  0x2e   : > { %v274_v28 = vrot.slane %v264_v18, %v259_v11  ;;  %v296_v29 = vrot.slane %v286_v19, %v285_v13  ;;  %v300_v30 = vrot.slane %v290_v20, %v285_v13  ;;  %v322_v43 = vrot.slane %v312_v31, %v311_v21 }
  0x2f   : > { %510 = vset.pattern.permute.xlu0 %v595_v5  ;;  %v326_v44 = vrot.slane %v316_v32, %v311_v21 }
  0x30   : > { %306 = vperm.xlu0 %510, %v218_v2  }
  0xa2   : > { %v223_v25 = vpop.permute.xlu0 %222  ;;  %v255_v26 = vpop.permute.xlu1 %254 }
  0xa3   : > { %v244_v33 = vmul.f32 %v239_v23, %v223_v25  ;;  %v245_v34 = vmul.f32 %v243_v24, %v223_v25  ;;  %v275_v36 = vmul.f32 %v270_v27, %v255_v26  ;;  %v276_v37 = vmul.f32 %v274_v28, %v255_v26 }
  0xa6   : > { %v249_v35 = vpop.permute.xlu0 %248 }
  0xa7   : > { %v251_v38 = vadd.f32 %v249_v35, %v244_v33  ;;  %v252_v39 = vadd.f32 %v249_v35, %v245_v34  ;;  %v281_v40 = vpop.permute.xlu1 %280 }
  0xa8   : > { %v301_v41 = vmul.f32 %v296_v29, %v281_v40  ;;  %v302_v42 = vmul.f32 %v300_v30, %v281_v40 }
  0xa9   : > { %v277_v45 = vadd.f32 %v275_v36, %v251_v38  ;;  %v278_v46 = vadd.f32 %v276_v37, %v252_v39 }
  0xab   : > { %v303_v47 = vadd.f32 %v301_v41, %v277_v45  ;;  %v304_v48 = vadd.f32 %v302_v42, %v278_v46  ;;  %v307_v49 = vpop.permute.xlu0 %306 }
  0xac   : > { %v327_v50 = vmul.f32 %v322_v43, %v307_v49  ;;  %v328_v51 = vmul.f32 %v326_v44, %v307_v49 }
  0xae   : > { %v329_v52 = vadd.f32 %v327_v50, %v303_v47  ;;  %v330_v53 = vadd.f32 %v328_v51, %v304_v48 }
  0xb0   : > { %v331_v54 = vmax.f32 %v329_v52, 0.0  ;;  %v332_v55 = vmax.f32 %v330_v53, 0.0 }
  0xb2   : > { %v335_v56 = vcombine.low %v331_v54, %v332_v55 }
  0xb4   : > { %337 = vst [vmem:[%s215_s30] sm:$0x77] %v335_v56 }
  0xb5 PF: > { %s16_s17 = sadd.s32 1, %s589_s17   ;;  %s729_s12 = smov %s573_s13 }
  0xb6   : > { %p13_p8 = scmp.ge.s32.totalorder %s16_s17, 4   ;;  %s730_s13 = smov %s577_s14 }
  0xb7   : > { %s731_s14 = smov %s665_s24  ;;  %s732_s15 = smov %s585_s16 }
  0xb8   : > { %s733_s16 = smov %s735_s19  ;;  %15 = sbr.rel (!%p13_p8) target bundleno = 4 (0x4), region = 72 }
  0xbd   :  { %368 = vsyncpa [#allocation3], 1 }
  0xbe   :  { %370 = vsyncpa [#allocation3 + $0x1], 1 }

</bundles_post_ra>
